<compile_context>
chip_gen: v5e
topology: v5e:2x2
jax: 0.10.0
libtpu: 0.0.40
codegen_flags: <defaults>
</compile_context>

<pallas_src>
import jax
import jax.numpy as jnp
from jax import lax
from jax.experimental import pallas as pl
from jax.experimental.pallas import tpu as pltpu


def _round_up(v: int, m: int) -> int:
    return ((v + m - 1) // m) * m


def _meta_linear_norm_kernel(x_ref, w_ref, o_ref, acc_ref, xsq_ref, wsq_ref):
    """Accumulate x@w, row ssq(x), col ssq(w) over K; scale in the last step."""
    k_step = pl.program_id(2)

    @pl.when(k_step == 0)
    def _init():
        acc_ref[...] = jnp.zeros_like(acc_ref)
        xsq_ref[...] = jnp.zeros_like(xsq_ref)
        wsq_ref[...] = jnp.zeros_like(wsq_ref)

    x = x_ref[...]  # (tm, tk) native dtype -> straight to the MXU
    w = w_ref[...]  # (tk, tn)

    acc_ref[...] += jnp.dot(x, w, preferred_element_type=jnp.float32)

    xf = x.astype(jnp.float32)
    wf = w.astype(jnp.float32)
    xsq_ref[...] += jnp.sum(xf * xf, axis=1, keepdims=True)  # (tm, 1)
    wsq_ref[...] += jnp.sum(wf * wf, axis=0, keepdims=True)  # (1, tn)

    @pl.when(k_step == pl.num_programs(2) - 1)
    def _finalize():
        # 1/max(||.||_2, eps) with eps = 1e-12  ==  min(rsqrt(ssq), 1e12)
        inv_eps = jnp.float32(1e12)
        inv_x = jnp.minimum(lax.rsqrt(xsq_ref[...]), inv_eps)  # (tm, 1)
        inv_w = jnp.minimum(lax.rsqrt(wsq_ref[...]), inv_eps)  # (1, tn)
        o_ref[...] = (acc_ref[...] * inv_x * inv_w).astype(o_ref.dtype)


def meta_linear_norm(x, weight, *, tm=256, tn=256, tk=512, vmem_limit_bytes=None):
    """out = F.normalize(x, dim=1) @ F.normalize(weight, dim=0).

    Tiled Pallas matmul with norm-scaling epilogue. Defaults (tm=tn=256,
    tk=512) fit comfortably inside every generation's scoped-VMEM default
    (v5e 16 MiB / v6e 32 MiB / v7x 32 MiB) with double-buffering; bump the
    tile constants / vmem_limit_bytes per-chip for large problems.
    """
    n, k = x.shape
    k2, m = weight.shape
    assert k == k2, "in_features mismatch"

    # Clamp tiles to the (rounded-up) problem size so tiny shapes do not
    # over-pad; keep lane dims multiples of 128 and sublane dims multiples of 8.
    tm = min(tm, _round_up(n, 8))
    tn = min(tn, _round_up(m, 128))
    tk = min(tk, _round_up(k, 128))

    n_pad = _round_up(n, tm)
    m_pad = _round_up(m, tn)
    k_pad = _round_up(k, tk)

    xp = x
    if (n_pad, k_pad) != (n, k):
        xp = jnp.pad(x, ((0, n_pad - n), (0, k_pad - k)))
    wp = weight
    if (k_pad, m_pad) != (k, m):
        wp = jnp.pad(weight, ((0, k_pad - k), (0, m_pad - m)))

    grid = (n_pad // tm, m_pad // tn, k_pad // tk)

    out = pl.pallas_call(
        _meta_linear_norm_kernel,
        out_shape=jax.ShapeDtypeStruct((n_pad, m_pad), x.dtype),
        grid=grid,
        in_specs=[
            pl.BlockSpec((tm, tk), lambda i, j, kk: (i, kk)),
            pl.BlockSpec((tk, tn), lambda i, j, kk: (kk, j)),
        ],
        out_specs=pl.BlockSpec((tm, tn), lambda i, j, kk: (i, j)),
        scratch_shapes=[
            pltpu.VMEM((tm, tn), jnp.float32),  # matmul accumulator
            pltpu.VMEM((tm, 1), jnp.float32),   # row sum-of-squares of x
            pltpu.VMEM((1, tn), jnp.float32),   # col sum-of-squares of w
        ],
        compiler_params=pltpu.CompilerParams(
            dimension_semantics=("parallel", "parallel", "arbitrary"),
            vmem_limit_bytes=vmem_limit_bytes,
        ),
    )(xp, wp)

    return out[:n, :m]


def init_weight(key, in_features, out_features):
    """Mimic MetaLinear_Norm.__init__:
    uniform_(-1, 1).renorm_(2, 1, 1e-5).mul_(1e5) on the (in, out) buffer
    == uniform(-1, 1) with each column rescaled to unit L2 norm."""
    w = jax.random.uniform(
        key, (in_features, out_features), minval=-1.0, maxval=1.0,
        dtype=jnp.float32,
    )
    col_norm = jnp.sqrt(jnp.sum(w * w, axis=0, keepdims=True))
    return w / jnp.maximum(col_norm, 1e-12)


def reference(x, w):
    """Pure-JAX reference of the PyTorch forward."""
    eps = 1e-12
    xn = x / jnp.maximum(jnp.linalg.norm(x, axis=1, keepdims=True), eps)
    wn = w / jnp.maximum(jnp.linalg.norm(w, axis=0, keepdims=True), eps)
    return xn @ wn


if __name__ == "__main__":
    key = jax.random.PRNGKey(0)

    # Case 1: tiny module-like shapes (single grid step, padded to a lane-dense
    #         output tile). Case 2: shapes that exercise the tiled (i, j, k)
    #         grid with K-accumulation across two steps and two output tiles.
    cases = [(8, 32, 16), (48, 640, 384)]
    for batch, in_features, out_features in cases:
        key, k_x, k_w = jax.random.split(key, 3)
        x = jax.random.normal(k_x, (batch, in_features), dtype=jnp.float32)
        weight = init_weight(k_w, in_features, out_features)

        out = jax.block_until_ready(meta_linear_norm(x, weight))
        ref = reference(x, weight)

        assert out.shape == (batch, out_features)
        assert jnp.allclose(out, ref, atol=1e-5, rtol=1e-5), (
            f"mismatch vs reference for shape {(batch, in_features, out_features)}"
        )

    print("KERNEL_OK")
</pallas_src>

<mosaic_0001>
module attributes {stable_mosaic.version = 11 : i64} {
  func.func @_meta_linear_norm_kernel(%arg0: i32, %arg1: i32, %arg2: i32, %arg3: memref<8x128xf32, #tpu.memory_space<vmem>>, %arg4: memref<128x128xf32, #tpu.memory_space<vmem>>, %arg5: memref<8x128xf32, #tpu.memory_space<vmem>>, %arg6: memref<8x128xf32, #tpu.memory_space<vmem>>, %arg7: memref<8x1xf32, #tpu.memory_space<vmem>>, %arg8: memref<1x128xf32, #tpu.memory_space<vmem>>) attributes {dimension_semantics = [#tpu.dimension_semantics<parallel>, #tpu.dimension_semantics<parallel>, #tpu.dimension_semantics<arbitrary>], iteration_bounds = array<i64: 1, 1, 1>, scalar_prefetch = 0 : i64, scratch_operands = 3 : i64, tpu.core_type = #tpu.core_type<tc>, window_params = [{transform_indices = @transform_0, window_bounds = array<i64: 8, 128>}, {transform_indices = @transform_1, window_bounds = array<i64: 128, 128>}, {transform_indices = @transform_2, window_bounds = array<i64: 8, 128>}]} {
    %c0_i32 = arith.constant 0 : i32
    %0 = arith.cmpi eq, %arg2, %c0_i32 : i32
    %1 = arith.extui %0 : i1 to i32
    %c0_i32_0 = arith.constant 0 : i32
    %2 = arith.cmpi ne, %1, %c0_i32_0 : i32
    scf.if %2 {
      %cst_20 = arith.constant 0.000000e+00 : f32
      %24 = vector.broadcast %cst_20 : f32 to vector<8x128xf32>
      %c0_21 = arith.constant 0 : index
      %c0_22 = arith.constant 0 : index
      %25 = vector.load %arg6[%c0_21, %c0_22] : memref<8x128xf32, #tpu.memory_space<vmem>>, vector<8x128xf32>
      tpu.vector_store %arg6[%c0_21, %c0_22], %24 {strides = array<i32>} : memref<8x128xf32, #tpu.memory_space<vmem>>, vector<8x128xf32>,
      %cst_23 = arith.constant 0.000000e+00 : f32
      %26 = vector.broadcast %cst_23 : f32 to vector<8x1xf32>
      %c0_24 = arith.constant 0 : index
      %c0_25 = arith.constant 0 : index
      %27 = vector.load %arg7[%c0_24, %c0_25] : memref<8x1xf32, #tpu.memory_space<vmem>>, vector<8x1xf32>
      tpu.vector_store %arg7[%c0_24, %c0_25], %26 {strides = array<i32>} : memref<8x1xf32, #tpu.memory_space<vmem>>, vector<8x1xf32>,
      %cst_26 = arith.constant 0.000000e+00 : f32
      %28 = vector.broadcast %cst_26 : f32 to vector<1x128xf32>
      %c0_27 = arith.constant 0 : index
      %c0_28 = arith.constant 0 : index
      %29 = vector.load %arg8[%c0_27, %c0_28] : memref<1x128xf32, #tpu.memory_space<vmem>>, vector<1x128xf32>
      tpu.vector_store %arg8[%c0_27, %c0_28], %28 {strides = array<i32>} : memref<1x128xf32, #tpu.memory_space<vmem>>, vector<1x128xf32>,
    } else {
    }
    %c0 = arith.constant 0 : index
    %c0_1 = arith.constant 0 : index
    %3 = vector.load %arg3[%c0, %c0_1] : memref<8x128xf32, #tpu.memory_space<vmem>>, vector<8x128xf32>
    %c0_2 = arith.constant 0 : index
    %c0_3 = arith.constant 0 : index
    %4 = vector.load %arg4[%c0_2, %c0_3] : memref<128x128xf32, #tpu.memory_space<vmem>>, vector<128x128xf32>
    %c0_4 = arith.constant 0 : index
    %c0_5 = arith.constant 0 : index
    %5 = vector.load %arg6[%c0_4, %c0_5] : memref<8x128xf32, #tpu.memory_space<vmem>>, vector<8x128xf32>
    %cst = arith.constant dense<0.000000e+00> : vector<8x128xf32>
    %6 = tpu.matmul %3, %4, %cst {dimension_numbers = #tpu.dot_dimension_numbers<[1], [0], [0], [1], [0, 0, 1, 1], [], []>} : vector<8x128xf32>, vector<128x128xf32>, vector<8x128xf32> -> vector<8x128xf32>
    %7 = arith.addf %5, %6 : vector<8x128xf32>
    %c0_6 = arith.constant 0 : index
    %c0_7 = arith.constant 0 : index
    %8 = vector.load %arg6[%c0_6, %c0_7] : memref<8x128xf32, #tpu.memory_space<vmem>>, vector<8x128xf32>
    tpu.vector_store %arg6[%c0_6, %c0_7], %7 {strides = array<i32>} : memref<8x128xf32, #tpu.memory_space<vmem>>, vector<8x128xf32>,
    %c0_8 = arith.constant 0 : index
    %c0_9 = arith.constant 0 : index
    %9 = vector.load %arg7[%c0_8, %c0_9] : memref<8x1xf32, #tpu.memory_space<vmem>>, vector<8x1xf32>
    %10 = arith.mulf %3, %3 : vector<8x128xf32>
    %cst_10 = arith.constant dense<0.000000e+00> : vector<8xf32>
    %11 = vector.multi_reduction <add>, %10, %cst_10 [1] : vector<8x128xf32> to vector<8xf32>
    %12 = vector.shape_cast %11 : vector<8xf32> to vector<8x1xf32>
    %13 = arith.addf %9, %12 : vector<8x1xf32>
    %c0_11 = arith.constant 0 : index
    %c0_12 = arith.constant 0 : index
    %14 = vector.load %arg7[%c0_11, %c0_12] : memref<8x1xf32, #tpu.memory_space<vmem>>, vector<8x1xf32>
    tpu.vector_store %arg7[%c0_11, %c0_12], %13 {strides = array<i32>} : memref<8x1xf32, #tpu.memory_space<vmem>>, vector<8x1xf32>,
    %c0_13 = arith.constant 0 : index
    %c0_14 = arith.constant 0 : index
    %15 = vector.load %arg8[%c0_13, %c0_14] : memref<1x128xf32, #tpu.memory_space<vmem>>, vector<1x128xf32>
    %16 = arith.mulf %4, %4 : vector<128x128xf32>
    %cst_15 = arith.constant dense<0.000000e+00> : vector<128xf32>
    %17 = vector.multi_reduction <add>, %16, %cst_15 [0] : vector<128x128xf32> to vector<128xf32>
    %18 = vector.shape_cast %17 : vector<128xf32> to vector<1x128xf32>
    %19 = arith.addf %15, %18 : vector<1x128xf32>
    %c0_16 = arith.constant 0 : index
    %c0_17 = arith.constant 0 : index
    %20 = vector.load %arg8[%c0_16, %c0_17] : memref<1x128xf32, #tpu.memory_space<vmem>>, vector<1x128xf32>
    tpu.vector_store %arg8[%c0_16, %c0_17], %19 {strides = array<i32>} : memref<1x128xf32, #tpu.memory_space<vmem>>, vector<1x128xf32>,
    %c0_i32_18 = arith.constant 0 : i32
    %21 = arith.cmpi eq, %arg2, %c0_i32_18 : i32
    %22 = arith.extui %21 : i1 to i32
    %c0_i32_19 = arith.constant 0 : i32
    %23 = arith.cmpi ne, %22, %c0_i32_19 : i32
    scf.if %23 {
      %c0_20 = arith.constant 0 : index
      %c0_21 = arith.constant 0 : index
      %24 = vector.load %arg7[%c0_20, %c0_21] : memref<8x1xf32, #tpu.memory_space<vmem>>, vector<8x1xf32>
      %25 = math.rsqrt %24 : vector<8x1xf32>
      %cst_22 = arith.constant 9.99999995E+11 : f32
      %26 = vector.broadcast %cst_22 : f32 to vector<8x1xf32>
      %27 = arith.minimumf %25, %26 : vector<8x1xf32>
      %c0_23 = arith.constant 0 : index
      %c0_24 = arith.constant 0 : index
      %28 = vector.load %arg8[%c0_23, %c0_24] : memref<1x128xf32, #tpu.memory_space<vmem>>, vector<1x128xf32>
      %29 = math.rsqrt %28 : vector<1x128xf32>
      %cst_25 = arith.constant 9.99999995E+11 : f32
      %30 = vector.broadcast %cst_25 : f32 to vector<1x128xf32>
      %31 = arith.minimumf %29, %30 : vector<1x128xf32>
      %c0_26 = arith.constant 0 : index
      %c0_27 = arith.constant 0 : index
      %32 = vector.load %arg6[%c0_26, %c0_27] : memref<8x128xf32, #tpu.memory_space<vmem>>, vector<8x128xf32>
      %33 = vector.broadcast %27 : vector<8x1xf32> to vector<8x128xf32>
      %34 = arith.mulf %32, %33 : vector<8x128xf32>
      %35 = vector.broadcast %31 : vector<1x128xf32> to vector<8x128xf32>
      %36 = arith.mulf %34, %35 : vector<8x128xf32>
      %c0_28 = arith.constant 0 : index
      %c0_29 = arith.constant 0 : index
      %37 = vector.load %arg5[%c0_28, %c0_29] : memref<8x128xf32, #tpu.memory_space<vmem>>, vector<8x128xf32>
      tpu.vector_store %arg5[%c0_28, %c0_29], %36 {strides = array<i32>} : memref<8x128xf32, #tpu.memory_space<vmem>>, vector<8x128xf32>,
    } else {
    }
    return
  }
  func.func @transform_0(%arg0: i32, %arg1: i32, %arg2: i32) -> (i32, i32) {
    %c0_i32 = arith.constant 0 : i32
    return %arg0, %arg2 : i32, i32
  }
  func.func @transform_1(%arg0: i32, %arg1: i32, %arg2: i32) -> (i32, i32) {
    %c0_i32 = arith.constant 0 : i32
    return %arg2, %arg1 : i32, i32
  }
  func.func @transform_2(%arg0: i32, %arg1: i32, %arg2: i32) -> (i32, i32) {
    %c0_i32 = arith.constant 0 : i32
    return %arg0, %arg1 : i32, i32
  }
}

</mosaic_0001>

<bundles_post_ra>
// kernel: tpu_custom_call.1
= control target key start
LH: loop header
LB: loop body
LE: loop exit
PB: predicated region body
PF: predicated region fallthrough
CT: control target
= control target key end

     0   :  { %7 = vsyncpa [#allocation6], 0  ;;  %s322_s0 = inlined_call_operand.hbm [shape: f32[8,128], index: 0, kind: input, shape index: {}]   ;;  %s323_s1 = inlined_call_operand.hbm [shape: f32[128,128], index: 1, kind: input, shape index: {}]   ;;  %s324_s2 = inlined_call_operand.hbm [shape: f32[8,128], index: 2, kind: output, shape index: {}]  }
   0x1   :  { %8 = vsyncpa [#allocation9], 0 }
   0x2   :  { %9 = vsyncpa [#allocation7], 0  ;;  %s15_s11 = sshll.u32 %s322_s0, 4  ;;  %s284_s12 = smov [#allocation5]   ;;  %s16_s11 = int_to_ptr.hbm [resolvable:$true] %s15_s11 }
   0x3   :  { %s17_s13 = sshll.u32 %s284_s12, 4  ;;  %s25_s16 = sshll.u32 %s323_s1, 4  ;;  %s18_s13 = int_to_ptr.vmem [resolvable:$true] %s17_s13  ;;  %s26_s16 = int_to_ptr.hbm [resolvable:$true] %s25_s16 }
   0x4   :  { %20 = dma.hbm_to_vmem [thread:$0]  %s16_s11, 128, %s18_s13, [#allocation6]  }
   0x5   :  { %s285_s17 = smov [#allocation8]   ;;  %s286_s19 = smov 128  }
   0x6   :  { %s27_s18 = sshll.u32 %s285_s17, 4  ;;  %s287_s20 = smov 8   ;;  %s28_s18 = int_to_ptr.vmem [resolvable:$true] %s27_s18 }
   0x7   :  { %33 = dma.hbm_to_vmem [thread:$0]  %s26_s16, 2048, %s28_s18, [#allocation9], %s286_s19, %s286_s19, %s287_s20  }
   0x8   :  { %278 = dma.done.wait [#allocation6], 128  }
   0x9   :  { %279 = vsyncadd [#allocation6], 4294967168 }
   0xa   :  { %280 = dma.done.wait [#allocation9], 2048  }
   0xb   :  { %281 = vsyncadd [#allocation9], 4294965248  ;;  %vm47_vm0 = vcmask 7168   ;;  %v288_v0 = vmov 0.0   ;;  %v50_v1 = vld [vmem:[#allocation5] sm:$0xff]  ;;  %v65_v3 = vld [vmem:[#allocation8 + $0x70] sm:$0xff] }
   0xc   :  { %48 = vst.msk [vmem:[#allocation3] sm:$0xff] %vm47_vm0, %v288_v0  ;;  %v313_v2 = vld [vmem:[#allocation8 + $0x78] sm:$0xff]  ;;  %v91_v4 = vmul.f32 %v50_v1, %v50_v1  ;;  %v64_v5 = vld [vmem:[#allocation8 + $0x68] sm:$0xff]  ;;  %v63_v6 = vld [vmem:[#allocation8 + $0x60] sm:$0xff]  ;;  %v289_v36 = vmov 0   ;;  %v112_v45 = vmul.f32 %v65_v3, %v65_v3  ;;  %s290_s0 = smov [#allocation10]  }
   0xd   :  { %49 = vst [vmem:[#allocation4] sm:$0x1] %v288_v0  ;;  %68 = vmatpush.msra.mxu0 %v313_v2  ;;  %v62_v7 = vld [vmem:[#allocation8 + $0x58] sm:$0xff]  ;;  %v61_v8 = vld [vmem:[#allocation8 + $0x50] sm:$0xff]  ;;  %v60_v9 = vld [vmem:[#allocation8 + $0x48] sm:$0xff]  ;;  %201 = vset.pattern.permute.xlu0 %v289_v36  ;;  %v110_v41 = vmul.f32 %v63_v6, %v63_v6  ;;  %v111_v43 = vmul.f32 %v64_v5, %v64_v5  ;;  %s181_s1 = sshll.u32 %s290_s0, 4  ;;  %s182_s1 = int_to_ptr.vmem [resolvable:$true] %s181_s1 }
   0xe   :  { %92 = vadd.xlane.f32.xlu0 %v91_v4  ;;  %v59_v10 = vld [vmem:[#allocation8 + $0x40] sm:$0xff]  ;;  %v58_v11 = vld [vmem:[#allocation8 + $0x38] sm:$0xff]  ;;  %v57_v12 = vld [vmem:[#allocation8 + $0x30] sm:$0xff]  ;;  %v107_v34 = vmul.f32 %v60_v9, %v60_v9  ;;  %v108_v37 = vmul.f32 %v61_v8, %v61_v8  ;;  %v109_v39 = vmul.f32 %v62_v7, %v62_v7  ;;  %v113_v48 = vmul.f32 %v313_v2, %v313_v2  ;;  %s183_s23 = sshll.u32 %s324_s2, 4  ;;  %s184_s23 = int_to_ptr.hbm [resolvable:$true] %s183_s23 }
   0xf   :  { %69 = vmatpush.msra.mxu0 %v65_v3  ;;  %v51_v13 = vld [vmem:[#allocation8] sm:$0xff]  ;;  %v52_v14 = vld [vmem:[#allocation8 + $0x8] sm:$0xff]  ;;  %v53_v15 = vld [vmem:[#allocation8 + $0x10] sm:$0xff]  ;;  %v104_v28 = vmul.f32 %v57_v12, %v57_v12  ;;  %v105_v30 = vmul.f32 %v58_v11, %v58_v11  ;;  %v106_v32 = vmul.f32 %v59_v10, %v59_v10 }
  0x10   :  { %v98_v16 = vmul.f32 %v51_v13, %v51_v13  ;;  %v56_v17 = vld [vmem:[#allocation8 + $0x28] sm:$0xff]  ;;  %v99_v18 = vmul.f32 %v52_v14, %v52_v14  ;;  %v100_v19 = vmul.f32 %v53_v15, %v53_v15  ;;  %v54_v20 = vld [vmem:[#allocation8 + $0x18] sm:$0xff]  ;;  %v55_v21 = vld [vmem:[#allocation8 + $0x20] sm:$0xff] }
  0x11   :  { %70 = vmatpush.msra.mxu0 %v64_v5  ;;  %v101_v22 = vmul.f32 %v54_v20, %v54_v20  ;;  %v102_v24 = vmul.f32 %v55_v21, %v55_v21  ;;  %v103_v26 = vmul.f32 %v56_v17, %v56_v17 }
  0x12   :  { %v114_v23 = vadd.f32 %v99_v18, %v98_v16 }
  0x13   :  { %71 = vmatpush.msra.mxu0 %v63_v6  ;;  %v90_v46 = vld [vmem:[#allocation3] sm:$0xff] }
  0x14   :  { %v115_v25 = vadd.f32 %v114_v23, %v100_v19  ;;  %v97_v60 = vld [vmem:[#allocation4] sm:$0x1] }
  0x15   :  { %72 = vmatpush.msra.mxu0 %v62_v7 }
  0x16   :  { %v116_v27 = vadd.f32 %v115_v25, %v101_v22 }
  0x17   :  { %73 = vmatpush.msra.mxu0 %v61_v8 }
  0x18   :  { %v117_v29 = vadd.f32 %v116_v27, %v102_v24 }
  0x19   :  { %74 = vmatpush.msra.mxu0 %v60_v9 }
  0x1a   :  { %v118_v31 = vadd.f32 %v117_v29, %v103_v26 }
  0x1b   :  { %75 = vmatpush.msra.mxu0 %v59_v10 }
  0x1c   :  { %v119_v33 = vadd.f32 %v118_v31, %v104_v28 }
  0x1d   :  { %76 = vmatpush.msra.mxu0 %v58_v11 }
  0x1e   :  { %v120_v35 = vadd.f32 %v119_v33, %v105_v30 }
  0x1f   :  { %77 = vmatpush.msra.mxu0 %v57_v12 }
  0x20   :  { %v121_v38 = vadd.f32 %v120_v35, %v106_v32 }
  0x21   :  { %78 = vmatpush.msra.mxu0 %v56_v17 }
  0x22   :  { %v122_v40 = vadd.f32 %v121_v38, %v107_v34 }
  0x23   :  { %79 = vmatpush.msra.mxu0 %v55_v21 }
  0x24   :  { %v123_v42 = vadd.f32 %v122_v40, %v108_v37 }
  0x25   :  { %80 = vmatpush.msra.mxu0 %v54_v20 }
  0x26   :  { %v124_v44 = vadd.f32 %v123_v42, %v109_v39 }
  0x27   :  { %81 = vmatpush.msra.mxu0 %v53_v15 }
  0x28   :  { %v125_v47 = vadd.f32 %v124_v44, %v110_v41 }
  0x29   :  { %82 = vmatpush.msra.mxu0 %v52_v14 }
  0x2a   :  { %v126_v50 = vadd.f32 %v125_v47, %v111_v43 }
  0x2b   :  { %83 = vmatpush.msra.mxu0 %v51_v13 }
  0x2c   :  { %84 = vmatmul.f32.vlgmr.msra.gmra.mxu0 %v50_v1  ;;  %v127_v52 = vadd.f32 %v126_v50, %v112_v45 }
  0x2e   :  { %v128_v53 = vadd.f32 %v127_v52, %v113_v48 }
  0x30   :  { %v129_v54 = vrot.slane %v128_v53, 4 }
  0x32   :  { %v130_v55 = vadd.f32 %v129_v54, %v128_v53 }
  0x34   :  { %v131_v56 = vrot.slane %v130_v55, 2 }
  0x36   :  { %v132_v58 = vadd.f32 %v131_v56, %v130_v55 }
  0x38   :  { %v133_v59 = vrot.slane %v132_v58, 1 }
  0x3a   :  { %v134_v61 = vadd.f32 %v133_v59, %v132_v58 }
  0x3c   :  { %v135_v63 = vadd.f32 %v134_v61, %v97_v60 }
  0x3e   :  { %136 = vst [vmem:[#allocation4] sm:$0x1] %v135_v63 }
  0x45   :  { %v152_v7 = vld [vmem:[#allocation4] sm:$0x1] }
  0x46   :  { %vm159_vm4 = vweird.f32 %v152_v7 }
  0x81   :  { %v93_v49 = vpop.xlane.xlu0 %92 }
  0x82   :  { %v94_v51 = vadd.f32 %v93_v49, %v90_v46 }
  0x84   :  { %96 = vst.msk [vmem:[#allocation3] sm:$0xff] %vm47_vm0, %v94_v51 }
  0x8b   :  { %v140_v57 = vld [vmem:[#allocation3] sm:$0xff] }
  0x8c   :  { %202 = vrsqrt.f32 %v140_v57  ;;  %vm147_vm2 = vweird.f32 %v140_v57 }
  0x8d   :  { %204 = vrsqrt.f32 %v152_v7 }
  0x92   :  { %v203_v62 = vpop.eup %202 }
  0x93   :  { %v142_v0 = vmul.f32 %v203_v62, %v140_v57  ;;  %vm148_vm1 = vweird.f32 %v203_v62  ;;  %v205_v8 = vpop.eup %204 }
  0x94   :  { %vm149_vm3 = vmor %vm147_vm2, %vm148_vm1  ;;  %v154_v9 = vmul.f32 %v205_v8, %v152_v7  ;;  %vm160_vm5 = vweird.f32 %v205_v8 }
  0x95   :  { %v143_v1 = vmul.f32 %v203_v62, %v142_v0  ;;  %vm161_vm6 = vmor %vm159_vm4, %vm160_vm5 }
  0x96   :  { %v155_v10 = vmul.f32 %v205_v8, %v154_v9 }
  0x97   :  { %v144_v2 = vmul.f32 0.5, %v143_v1 }
  0x98   :  { %v156_v11 = vmul.f32 0.5, %v155_v10 }
  0x99   :  { %v145_v3 = vsub.f32 1.5, %v144_v2 }
  0x9a   :  { %v157_v12 = vsub.f32 1.5, %v156_v11 }
  0x9b   :  { %v146_v4 = vmul.f32 %v203_v62, %v145_v3 }
  0x9c   :  { %v158_v13 = vmul.f32 %v205_v8, %v157_v12 }
  0x9d   :  { %v150_v5 = vsel %vm149_vm3, %v203_v62, %v146_v4 }
  0x9e   :  { %v151_v6 = vmin.f32 %v150_v5, 1e+12  ;;  %v162_v14 = vsel %vm161_vm6, %v205_v8, %v158_v13 }
  0x9f   :  { %v163_v15 = vmin.f32 %v162_v14, 1e+12 }
  0xa0   :  { %167 = vperm.xlu0 %201, %v151_v6  }
  0xa1   :  { %v172_v17 = vperm.slane %v163_v15, 0 }
  0xa9   :  { %v85_v16 = vpop.f32.mrf.mxu0 }
 0x112   :  { %v168_v18 = vpop.permute.xlu0 %167 }
 0x113   :  { %v170_v19 = vmul.f32 %v168_v18, %v85_v16 }
 0x115   :  { %v174_v20 = vmul.f32 %v172_v17, %v170_v19 }
 0x117   :  { %175 = vst [vmem:[#allocation10] sm:$0xff] %v174_v20 }
 0x118   :  { %186 = dma.vmem_to_hbm [thread:$0]  %s182_s1, 128, %s184_s23, [#allocation7]  }
 0x119   :  { %282 = dma.done.wait [#allocation7], 128  }
 0x11a   :  { %283 = vsyncadd [#allocation7], 4294967168 }
 0x11b   :  { %191 = vsyncpa [#allocation6], 1 }
 0x11c   :  { %192 = vsyncpa [#allocation9], 1 }
 0x11d   :  { %193 = vsyncpa [#allocation7], 1 }

</bundles_post_ra>
